<compile_context>
chip_gen: v5e
topology: v5e:2x2
jax: 0.10.0
libtpu: 0.0.40
codegen_flags: <defaults>
</compile_context>

<pallas_src>
import functools

import jax
import jax.numpy as jnp
from jax.experimental import pallas as pl
from jax.experimental.pallas import tpu as pltpu

EPS = 1e-6


def residual_connection_kernel(seed_ref, x_ref, params_ref, w_ref, o_ref, *,
                               features, dropout_rate, training, mxu_dtype):
    # x tile: (TM, F), compute stats in f32.
    x = x_ref[...].astype(jnp.float32)

    alpha = params_ref[0:1, :]
    beta = params_ref[1:2, :]
    bias = params_ref[2:3, :]

    # --- LayerNormalization (torch.std default: unbiased ddof=1; eps on std) ---
    mean = jnp.mean(x, axis=-1, keepdims=True)
    diff = x - mean
    var = jnp.sum(diff * diff, axis=-1, keepdims=True) * (1.0 / (features - 1))
    std = jnp.sqrt(var)
    inv_std = pl.reciprocal(std + EPS, approx=True)      # EUP slot, frees VALU
    normed = alpha * diff * inv_std + beta

    # --- sublayer: Linear(F, F) on the MXU, bf16 inputs / f32 accumulate ---
    sub = jnp.dot(normed.astype(mxu_dtype), w_ref[...],
                  preferred_element_type=jnp.float32)
    sub = sub + bias

    # --- inverted dropout (training only) ---
    if training and dropout_rate > 0.0:
        # NOTE: mask stream depends on (seed, program_id) and therefore on the
        # chosen tile size / megacore sharding; derive from the absolute row
        # index if tiling-invariant reproducibility is ever required.
        pltpu.prng_seed(seed_ref[0] + pl.program_id(0))
        bits = pltpu.bitcast(pltpu.prng_random_bits(sub.shape), jnp.uint32)
        # Threshold clamps at uint32 max: for rate ~ 1.0 keep prob is 2^-32.
        thr = jnp.uint32(min(int(round(dropout_rate * 4294967296.0)), 4294967295))
        keep = bits >= thr                               # P(keep) = 1 - rate
        sub = jnp.where(keep, sub * (1.0 / (1.0 - dropout_rate)), 0.0)

    # --- residual add ---
    o_ref[...] = (x + sub).astype(o_ref.dtype)


def _const_block_spec(shape, index_map):
    """BlockSpec for a grid-invariant input; single-buffer it when supported."""
    try:
        return pl.BlockSpec(shape, index_map, pipeline_mode=pl.Buffered(1))
    except Exception:  # older BlockSpec signature: fall back to default buffering
        return pl.BlockSpec(shape, index_map)


def _pick_tile_rows(M, target):
    """Largest sublane-aligned row tile <= target.

    Prefers exact divisors of M (avoids a host-side pad copy of x in HBM) and
    caps the tile at M//2 so the grid has >=2 steps (v7x megacore sharding).
    Returns (tile_rows, padded_rows)."""
    if M <= 8:
        return M, M                                  # single full block
    if M >= 16:
        target = min(target, (M // 2) // 8 * 8)      # guarantee >= 2 grid steps
    target = max(8, (min(target, M) // 8) * 8)
    for tm in range(target, 7, -8):                  # all candidates are %8==0
        if M % tm == 0:
            return tm, M                             # exact divisor: no padding
    return target, pl.cdiv(M, target) * target       # rare fallback: pad rows


def residual_connection(x, alpha, beta, w, b, *, dropout_rate=0.1, training=False,
                        seed=0, tile_rows=1024, mxu_dtype=jnp.bfloat16,
                        out_dtype=None):
    """x: (B, S, F); alpha/beta/b: (F,); w: (F, F)."""
    B, S, F = x.shape
    assert F > 1, "unbiased std (ddof=1) requires features > 1"
    M = B * S
    out_dtype = x.dtype if out_dtype is None else out_dtype

    x_bytes = jnp.dtype(x.dtype).itemsize
    out_bytes = jnp.dtype(out_dtype).itemsize
    w_bytes = F * F * jnp.dtype(mxu_dtype).itemsize
    param_bytes = 3 * F * 4

    # VMEM budget: conservative 48 MiB (safe on v7x's 64 MiB/TC physical),
    # raised when the chip reports >=100 MiB physical VMEM (v5e/v6e: 128 MiB).
    vmem_cap = 48 << 20
    try:
        if int(pltpu.get_tpu_info().vmem_capacity_bytes) >= (100 << 20):
            vmem_cap = 96 << 20
    except Exception:
        pass

    # Cap the row tile so double-buffered x/out tiles + resident W + headroom fit.
    per_row = 2 * F * (x_bytes + out_bytes)
    avail = vmem_cap - w_bytes - 2 * param_bytes - (4 << 20)
    assert avail > 8 * per_row, (
        "resident (F, F) weight leaves no VMEM for row tiles; K-tile W with an "
        "'arbitrary' reduction grid axis + f32 accumulator for this feature size")
    max_rows = max(8, (avail // per_row) // 8 * 8)

    tm, M_pad = _pick_tile_rows(M, min(tile_rows, max_rows))

    x2 = x.reshape(M, F)
    if M_pad != M:
        # Fallback only (M has no usable sublane-aligned divisor). Padded rows
        # are per-row self-contained and sliced off after the kernel.
        x2 = jnp.pad(x2, ((0, M_pad - M), (0, 0)))

    # Pack the three (F,) params into one grid-invariant (3, F) input.
    params = jnp.stack([alpha.astype(jnp.float32),
                        beta.astype(jnp.float32),
                        b.astype(jnp.float32)], axis=0)
    w_mxu = w.astype(mxu_dtype)                       # halves W's HBM/VMEM bytes
    seed_arr = jnp.array([seed], dtype=jnp.int32)

    kernel = functools.partial(
        residual_connection_kernel,
        features=F,
        dropout_rate=float(dropout_rate),
        training=bool(training),
        mxu_dtype=mxu_dtype,
    )

    # Real footprint (+4 MiB headroom) rather than claiming all of VMEM.
    footprint = (2 * tm * F * x_bytes + 2 * tm * F * out_bytes
                 + w_bytes + 2 * param_bytes)
    vmem_limit = int(min(max(footprint + (4 << 20), 16 << 20), vmem_cap))

    cost = pl.CostEstimate(
        flops=2 * M_pad * F * F + 8 * M_pad * F,
        transcendentals=2 * M_pad,
        bytes_accessed=M_pad * F * (x_bytes + out_bytes) + w_bytes + param_bytes,
    )

    out = pl.pallas_call(
        kernel,
        out_shape=jax.ShapeDtypeStruct((M_pad, F), out_dtype),
        grid_spec=pltpu.PrefetchScalarGridSpec(
            num_scalar_prefetch=1,
            grid=(M_pad // tm,),
            in_specs=[
                pl.BlockSpec((tm, F), lambda i, seed: (i, 0)),        # x rows
                _const_block_spec((3, F), lambda i, seed: (0, 0)),    # alpha/beta/bias
                _const_block_spec((F, F), lambda i, seed: (0, 0)),    # W (bf16, resident)
            ],
            out_specs=pl.BlockSpec((tm, F), lambda i, seed: (i, 0)),
        ),
        compiler_params=pltpu.CompilerParams(
            dimension_semantics=("parallel",),
            vmem_limit_bytes=vmem_limit,
        ),
        cost_estimate=cost,
    )(seed_arr, x2, params, w_mxu)

    if M_pad != M:
        out = out[:M]
    return out.reshape(B, S, F)


def _reference(x, alpha, beta, w, b, mxu_dtype=jnp.bfloat16):
    # Pure-JAX eval-mode reference (dropout = identity), mirroring the bf16 MXU cast.
    xf = x.astype(jnp.float32)
    mean = jnp.mean(xf, axis=-1, keepdims=True)
    var = jnp.sum((xf - mean) ** 2, axis=-1, keepdims=True) / (x.shape[-1] - 1)
    std = jnp.sqrt(var)
    normed = alpha * (xf - mean) / (std + EPS) + beta
    sub = jnp.dot(normed.astype(mxu_dtype), w.astype(mxu_dtype),
                  preferred_element_type=jnp.float32) + b
    return (xf + sub).astype(x.dtype)


if __name__ == "__main__":
    B, S, F = 2, 64, 128  # batch, seq, features (lane-dense F; M=128 -> 2 grid steps)
    key = jax.random.PRNGKey(0)
    kx, kw = jax.random.split(key)

    x = jax.random.normal(kx, (B, S, F), dtype=jnp.float32)

    # LayerNormalization parameters (as in __init__): alpha = ones, bias = zeros.
    alpha = jnp.ones((F,), dtype=jnp.float32)
    beta = jnp.zeros((F,), dtype=jnp.float32)

    # Concrete sublayer parameters (Linear F -> F), deterministic init.
    w = jax.random.normal(kw, (F, F), dtype=jnp.float32) * (1.0 / jnp.sqrt(F))
    b = jnp.zeros((F,), dtype=jnp.float32)

    out = residual_connection(x, alpha, beta, w, b,
                              dropout_rate=0.1, training=False, seed=0)
    out = jax.block_until_ready(out)

    ref = _reference(x, alpha, beta, w, b)
    assert out.shape == (B, S, F)
    err = float(jnp.max(jnp.abs(out.astype(jnp.float32) - ref.astype(jnp.float32))))
    assert jnp.allclose(out, ref, atol=2e-2, rtol=2e-2), f"max abs err = {err}"

    # TODO(synk): `sublayer` is an arbitrary callable in PyTorch; it is
    # instantiated as a Linear(features, features) so it can be fused in-kernel.
    print("KERNEL_OK")
</pallas_src>

<mosaic_0001>
module attributes {stable_mosaic.version = 11 : i64} {
  func.func @residual_connection_kernel(%arg0: i32, %arg1: memref<1xi32, #tpu.memory_space<smem>>, %arg2: memref<64x128xf32, #tpu.memory_space<vmem>>, %arg3: memref<3x128xf32, #tpu.memory_space<vmem>>, %arg4: memref<128x128xbf16, #tpu.memory_space<vmem>>, %arg5: memref<64x128xf32, #tpu.memory_space<vmem>>) attributes {dimension_semantics = [#tpu.dimension_semantics<parallel>], iteration_bounds = array<i64: 2>, scalar_prefetch = 1 : i64, scratch_operands = 0 : i64, tpu.core_type = #tpu.core_type<tc>, window_params = [{transform_indices = @transform_0, window_bounds = array<i64: 64, 128>}, {pipeline_mode = #tpu.pipeline_mode<synchronous>, transform_indices = @transform_1, window_bounds = array<i64: 3, 128>}, {pipeline_mode = #tpu.pipeline_mode<synchronous>, transform_indices = @transform_2, window_bounds = array<i64: 128, 128>}, {transform_indices = @transform_3, window_bounds = array<i64: 64, 128>}]} {
    %c0 = arith.constant 0 : index
    %c0_0 = arith.constant 0 : index
    %0 = vector.load %arg2[%c0, %c0_0] : memref<64x128xf32, #tpu.memory_space<vmem>>, vector<64x128xf32>
    %c0_1 = arith.constant 0 : index
    %c0_2 = arith.constant 0 : index
    %1 = vector.load %arg3[%c0_1, %c0_2] : memref<3x128xf32, #tpu.memory_space<vmem>>, vector<1x128xf32>
    %c1 = arith.constant 1 : index
    %c0_3 = arith.constant 0 : index
    %2 = vector.load %arg3[%c1, %c0_3] : memref<3x128xf32, #tpu.memory_space<vmem>>, vector<1x128xf32>
    %c2 = arith.constant 2 : index
    %c0_4 = arith.constant 0 : index
    %3 = vector.load %arg3[%c2, %c0_4] : memref<3x128xf32, #tpu.memory_space<vmem>>, vector<1x128xf32>
    %cst = arith.constant dense<0.000000e+00> : vector<64xf32>
    %4 = vector.multi_reduction <add>, %0, %cst [1] : vector<64x128xf32> to vector<64xf32>
    %5 = vector.shape_cast %4 : vector<64xf32> to vector<64x1xf32>
    %cst_5 = arith.constant 1.280000e+02 : f32
    %6 = vector.broadcast %cst_5 : f32 to vector<64x1xf32>
    %7 = arith.divf %5, %6 : vector<64x1xf32>
    %8 = vector.broadcast %7 : vector<64x1xf32> to vector<64x128xf32>
    %9 = arith.subf %0, %8 : vector<64x128xf32>
    %10 = arith.mulf %9, %9 : vector<64x128xf32>
    %cst_6 = arith.constant dense<0.000000e+00> : vector<64xf32>
    %11 = vector.multi_reduction <add>, %10, %cst_6 [1] : vector<64x128xf32> to vector<64xf32>
    %12 = vector.shape_cast %11 : vector<64xf32> to vector<64x1xf32>
    %cst_7 = arith.constant 0.00787401571 : f32
    %13 = vector.broadcast %cst_7 : f32 to vector<64x1xf32>
    %14 = arith.mulf %12, %13 : vector<64x1xf32>
    %15 = math.sqrt %14 : vector<64x1xf32>
    %cst_8 = arith.constant 9.99999997E-7 : f32
    %16 = vector.broadcast %cst_8 : f32 to vector<64x1xf32>
    %17 = arith.addf %15, %16 : vector<64x1xf32>
    %18 = tpu.reciprocal %17 {approx = true} : vector<64x1xf32> -> vector<64x1xf32>
    %19 = vector.broadcast %1 : vector<1x128xf32> to vector<64x128xf32>
    %20 = arith.mulf %19, %9 : vector<64x128xf32>
    %21 = vector.broadcast %18 : vector<64x1xf32> to vector<64x128xf32>
    %22 = arith.mulf %20, %21 : vector<64x128xf32>
    %23 = vector.broadcast %2 : vector<1x128xf32> to vector<64x128xf32>
    %24 = arith.addf %22, %23 : vector<64x128xf32>
    %25 = arith.truncf %24 : vector<64x128xf32> to vector<64x128xbf16>
    %c0_9 = arith.constant 0 : index
    %c0_10 = arith.constant 0 : index
    %26 = vector.load %arg4[%c0_9, %c0_10] : memref<128x128xbf16, #tpu.memory_space<vmem>>, vector<128x128xbf16>
    %cst_11 = arith.constant dense<0.000000e+00> : vector<64x128xf32>
    %27 = tpu.matmul %25, %26, %cst_11 {dimension_numbers = #tpu.dot_dimension_numbers<[1], [0], [0], [1], [0, 0, 1, 1], [], []>} : vector<64x128xbf16>, vector<128x128xbf16>, vector<64x128xf32> -> vector<64x128xf32>
    %28 = vector.broadcast %3 : vector<1x128xf32> to vector<64x128xf32>
    %29 = arith.addf %27, %28 : vector<64x128xf32>
    %30 = arith.addf %0, %29 : vector<64x128xf32>
    %c0_12 = arith.constant 0 : index
    %c0_13 = arith.constant 0 : index
    %31 = vector.load %arg5[%c0_12, %c0_13] : memref<64x128xf32, #tpu.memory_space<vmem>>, vector<64x128xf32>
    tpu.vector_store %arg5[%c0_12, %c0_13], %30 {strides = array<i32>} : memref<64x128xf32, #tpu.memory_space<vmem>>, vector<64x128xf32>,
    return
  }
  func.func @transform_0(%arg0: i32, %arg1: memref<1xi32, #tpu.memory_space<smem>>) -> (i32, i32) {
    %c0_i32 = arith.constant 0 : i32
    %c0_i32_0 = arith.constant 0 : i32
    return %arg0, %c0_i32 : i32, i32
  }
  func.func @transform_1(%arg0: i32, %arg1: memref<1xi32, #tpu.memory_space<smem>>) -> (i32, i32) {
    %c0_i32 = arith.constant 0 : i32
    %c0_i32_0 = arith.constant 0 : i32
    %c0_i32_1 = arith.constant 0 : i32
    return %c0_i32, %c0_i32_0 : i32, i32
  }
  func.func @transform_2(%arg0: i32, %arg1: memref<1xi32, #tpu.memory_space<smem>>) -> (i32, i32) {
    %c0_i32 = arith.constant 0 : i32
    %c0_i32_0 = arith.constant 0 : i32
    %c0_i32_1 = arith.constant 0 : i32
    return %c0_i32, %c0_i32_0 : i32, i32
  }
  func.func @transform_3(%arg0: i32, %arg1: memref<1xi32, #tpu.memory_space<smem>>) -> (i32, i32) {
    %c0_i32 = arith.constant 0 : i32
    %c0_i32_0 = arith.constant 0 : i32
    return %arg0, %c0_i32 : i32, i32
  }
}

</mosaic_0001>

<bundles_post_ra>
// kernel: tpu_custom_call.1
= control target key start
LH: loop header
LB: loop body
LE: loop exit
PB: predicated region body
PF: predicated region fallthrough
CT: control target
= control target key end

     0   :  { %s1397_s0 = inlined_call_operand.<no memory space> [shape: s32[1], index: 0, kind: input, shape index: {}]   ;;  %s1398_s1 = inlined_call_operand.hbm [shape: f32[128,128], index: 1, kind: input, shape index: {}]   ;;  %s1399_s2 = inlined_call_operand.hbm [shape: f32[3,128], index: 2, kind: input, shape index: {}]   ;;  %s1400_s3 = inlined_call_operand.hbm [shape: bf16[128,128], index: 3, kind: input, shape index: {}]   ;;  %s1401_s4 = inlined_call_operand.hbm [shape: f32[128,128], index: 4, kind: output, shape index: {}]  }
   0x1   :  { %1402 = sst [smem:[#allocation14_spill]] %s1399_s2 }
   0x2   :  { %10 = vsyncpa [#allocation5], 0 }
   0x3   :  { %12 = vsyncpa [#allocation5 + $0x1], 0 }
   0x4   :  { %13 = vsyncpa [#allocation8], 0 }
   0x5   :  { %14 = vsyncpa [#allocation6], 0 }
   0x6   :  { %16 = vsyncpa [#allocation6 + $0x1], 0  ;;  %s1059_s15 = smov 0   ;;  %s1061_s0 = smov 0  }
   0x7   :  { %s1063_s16 = smov 0   ;;  %s1065_s17 = smov 0  }
   0x8 LB: > { %s1080_s18 = sadd.s32 4294967295, %s1023_s17   ;;  %s668_s19 = sadd.s32 4294967294, %s1023_s17   ;;  %s1023_s17 = sphi %s1065_s17, %s1414_s17   ;;  %s1019_s16 = sphi %s1063_s16, %s1413_s16   ;;  %s1015_s0 = sphi %s1061_s0, %s1412_s0   ;;  %s1011_s15 = sphi %s1059_s15, %s1411_s15  }
   0x9   : > { %s1084_s20 = sadd.s32 1, %s1023_s17   ;;  %s29_s21 = sadd.s32 1, %s1019_s16 }
   0xa   : > { %s26_s22 = ssub.s32 %s1023_s17, %s1084_s20  ;;  %p36_p0 = scmp.ne.s32.totalorder %s1019_s16, %s1015_s0 }
   0xb   : > { %p27_p1 = scmp.eq.s32.totalorder %s26_s22, 0  ;;  %p37_p2 = scmp.eq.s32.totalorder %s1023_s17, 0 }
   0xc   : > { %p42_p3 = scmp.ne.s32.totalorder %s1015_s0, %s1011_s15  ;;  %p43_p4 = scmp.eq.s32.totalorder %s1080_s18, 0 }
   0xd   : > { %s1096_s23 = scalar_select %p27_p1, %s1019_s16, %s29_s21  }
   0xe   : > { %p1098_p5 = por %p37_p2, %p36_p0  ;;  %p1104_p6 = por %p43_p4, %p42_p3 }
   0xf   : > { %p108_p7 = scmp.eq.s32.totalorder %s1080_s18, 1  ;;  %p114_p8 = scmp.eq.s32.totalorder %s668_s19, 1 }
  0x10   : > { %p669_p9 = scmp.ge.s32.totalorder %s1023_s17, 1  ;;  %p121_p10 = scmp.lt.s32.totalorder %s1023_s17, 3 }
  0x11   : > { %p1111_p11 = por %p108_p7, %p36_p0  ;;  %p1115_p12 = por %p114_p8, %p42_p3 }
  0x12   : > { %p1119_p13 = pnand %p669_p9, %p121_p10  ;;  %s1408_s2 = sld [smem:[#allocation14_spill]] }
  0x13   : > { %s1025_s6 = smov [#allocation7]   ;;  %p781_p3 = scmp.lt.s32.totalorder %s1023_s17, 2 }
  0x14   : > { %p764_p1 = pneg %p1119_p13  ;;  %s135_s7 = sshll.u32 %s1025_s6, 4  ;;  %s136_s7 = int_to_ptr.vmem [resolvable:$true] %s135_s7 }
  0x15   : > { %s144_s10 = sshll.u32 %s1400_s3, 4  ;;  %p1137_p7 = pnand %p781_p3, %p1098_p5  ;;  %s145_s10 = int_to_ptr.hbm [resolvable:$true] %s144_s10 }
  0x16   : > { %p765_p2 = pnand %p764_p1, %p43_p4  ;;  %s1026_s12 = smov [#allocation9]  }
  0x17   : > { %s146_s13 = sshll.u32 %s1026_s12, 4  ;;  %s160_s14 = sand.u32 1, %s1019_s16   ;;  %s147_s13 = int_to_ptr.vmem [resolvable:$true] %s146_s13 }
  0x18   : > { %s133_s5 = sshll.u32 %s1408_s2, 4  ;;  %s1027_s19 = smov 64   ;;  %s134_s5 = int_to_ptr.hbm [resolvable:$true] %s133_s5 }
  0x19   : > { %767 = dma.hbm_to_vmem [thread:$0]  (!%p765_p2), %s134_s5, 64, %s136_s7, [#allocation8]  }
  0x1a   : > { %s1028_s21 = smov 4   ;;  %s673_s22 = sshll.u32 %s160_s14, 6 }
  0x1b   : > { %770 = dma.hbm_to_vmem [thread:$0]  (!%p765_p2), %s145_s10, 1024, %s147_s13, [#allocation8], %s1027_s19, %s1027_s19, %s1028_s21  }
  0x1c   : > { %s718_s29 = sshll.u32 %s1023_s17, 6  ;;  %s164_s5 = scalar_lea.vmem [#allocation4], %s673_s22 }
  0x1d   : > { %s169_s8 = scalar_lea.hbm %s1398_s1, %s718_s29  ;;  %s172_s24 = sshll.u32 %s164_s5, 4  ;;  %s173_s24 = int_to_ptr.vmem [resolvable:$true] %s172_s24 }
  0x1e   : > { %s170_s7 = sshll.u32 %s169_s8, 4  ;;  %s161_s9 = scalar_lea.sflag [#allocation5], %s160_s14  ;;  %s171_s7 = int_to_ptr.hbm [resolvable:$true] %s170_s7 }
  0x1f   : > { %s923_s2 = sshra.s32 %s171_s7, 4  ;;  %p927_p8 = pneg %p1137_p7  ;;  %s924_s2 = int_to_ptr.hbm [resolvable:$true] %s923_s2 }
  0x20   : > { %s925_s12 = scalar_lea.hbm %s924_s2, 64  ;;  %s930_s19 = scalar_lea.hbm %s1398_s1, 128 }
  0x21   : > { %p926_p5 = scmp.ne.s32.totalorder %s924_s2, %s925_s12  ;;  %p931_p1 = scmp.lt.s32.totalorder %s924_s2, %s1398_s1 }
  0x22   : > { %p932_p2 = scmp.lt.s32.totalorder %s930_s19, %s925_s12 }
  0x23   : > { %p928_p9 = pnand %p927_p8, %p926_p5 }
  0x24   : > { %p933_p3 = por %p932_p2, %p931_p1 }
  0x25   : > { %p929_p10 = pneg %p928_p9 }
  0x27   : > { %p934_p0 = pnand %p933_p3, %p929_p10 }
  0x29   : > { %937 = shalt.err (!%p934_p0)
}
  0x2a   : > { %s1029_s14 = smov 128   ;;  %s1030_s22 = smov 8  }
  0x2b   : > { %774 = dma.hbm_to_vmem [thread:$0]  (!%p1137_p7), %s171_s7, 1024, %s173_s24, %s161_s9, %s1029_s14, %s1029_s14, %s1030_s22  }
  0x2c   : > { %184 = sbr.rel (%p1119_p13) target bundleno = 496 (0x1f0), region = 32  ;;  %s1159_s30 = sand.u32 (!%p1119_p13), 1, %s1015_s0  }
  0x2d   : > { %s677_s2 = sshll.u32 (!%p1119_p13), %s1159_s30, 6  ;;  %s187_s6 = scalar_lea.sflag (!%p1119_p13), [#allocation5], %s1159_s30 }
  0x2e   : > { %s190_s8 = scalar_lea.vmem (!%p1119_p13), [#allocation4], %s677_s2 }
  0x31   : > { %998 = dma.done.wait (%p1104_p6), %s187_s6, 1024  }
  0x32   : > { %1000 = vsyncadd (%p1104_p6), %s187_s6, 4294966272 }
  0x33   : > { %1002 = dma.done.wait (%p43_p4), [#allocation8], 1088  }
  0x34   : > { %1004 = vsyncadd (%p43_p4), [#allocation8], 4294966208  ;;  %v1173_v0 = vld [vmem:[%s190_s8 + $0x30] sm:$0xff]  ;;  %v1175_v1 = vld [vmem:[%s190_s8 + $0x20] sm:$0xff]  ;;  %v1031_v8 = vmov 128.0   ;;  %s1346_s25 = scalar_lea.vmem [#allocation10], %s677_s2 }
  0x35   : > { %v1177_v2 = vld [vmem:[%s190_s8] sm:$0xff]  ;;  %249 = vadd.xlane.f32.xlu1 %v1173_v0  ;;  %245 = vadd.xlane.f32.xlu0 %v1175_v1  ;;  %v1182_v3 = vld [vmem:[%s190_s8 + $0x38] sm:$0xff]  ;;  %v1184_v4 = vld [vmem:[%s190_s8 + $0x28] sm:$0xff]  ;;  %829 = vrcp.f32 %v1031_v8  ;;  %s727_s28 = sshll.u32 %s1080_s18, 6  ;;  %s573_s7 = sshll.u32 %s1346_s25, 4  ;;  %s574_s7 = int_to_ptr.vmem [resolvable:$true] %s573_s7 }
  0x36   : > { %237 = vadd.xlane.f32.xlu2 %v1177_v2  ;;  %v1186_v5 = vld [vmem:[%s190_s8 + $0x8] sm:$0xff]  ;;  %v1191_v6 = vld [vmem:[%s190_s8 + $0x10] sm:$0xff]  ;;  %v1193_v7 = vld [vmem:[%s190_s8 + $0x18] sm:$0xff]  ;;  %s572_s24 = scalar_lea.hbm %s1401_s4, %s727_s28  ;;  %s561_s18 = scalar_lea.sflag [#allocation6], %s1159_s30 }
  0x37   : > { %v726_v47 = vld [vmem:[#allocation9 + $0x38] sm:$0xff]  ;;  %v725_v48 = vld [vmem:[#allocation9 + $0x30] sm:$0xff]  ;;  %v724_v49 = vld [vmem:[#allocation9 + $0x28] sm:$0xff]  ;;  %s575_s9 = sshll.u32 %s572_s24, 4  ;;  %s973_s21 = scalar_lea.hbm %s1401_s4, 128  ;;  %s576_s9 = int_to_ptr.hbm [resolvable:$true] %s575_s9 }
  0x38   : > { %729 = vmatpush.bf16.msra.mxu2 %v726_v47  ;;  %730 = vmatpush.bf16.msra.mxu3 %v726_v47  ;;  %v723_v50 = vld [vmem:[#allocation9 + $0x20] sm:$0xff]  ;;  %v722_v53 = vld [vmem:[#allocation9 + $0x18] sm:$0xff]  ;;  %v721_v56 = vld [vmem:[#allocation9 + $0x10] sm:$0xff]  ;;  %s967_s12 = sshra.s32 %s576_s9, 4  ;;  %s968_s12 = int_to_ptr.hbm [resolvable:$true] %s967_s12 }
  0x39   : > { %515 = vmatpush.bf16.msra.mxu0 %v726_v47  ;;  %728 = vmatpush.bf16.msra.mxu1 %v726_v47  ;;  %v720_v57 = vld [vmem:[#allocation9 + $0x8] sm:$0xff]  ;;  %s969_s10 = scalar_lea.hbm %s968_s12, 64  ;;  %p974_p0 = scmp.lt.s32.totalorder %s968_s12, %s1401_s4 }
  0x3a   : > { %p970_p4 = scmp.ne.s32.totalorder %s968_s12, %s969_s10  ;;  %p975_p7 = scmp.lt.s32.totalorder %s973_s21, %s969_s10 }
  0x3b   : > { %v830_v9 = vpop.eup %829 }
  0x3c   : > { %v254_v10 = vmul.f32 128.0, %v830_v9  ;;  %vm258_vm0 = vweird.f32 %v830_v9  ;;  %732 = vmatpush.bf16.msra.mxu2 %v725_v48  ;;  %733 = vmatpush.bf16.msra.mxu3 %v725_v48  ;;  %p971_p6 = pnand %p970_p4, %p1111_p11  ;;  %p976_p5 = por %p975_p7, %p974_p0 }
  0x3d   : > { %251 = vadd.xlane.f32.xlu1 %v1182_v3  ;;  %247 = vadd.xlane.f32.xlu0 %v1184_v4 }
  0x3e   : > { %239 = vadd.xlane.f32.xlu2 %v1186_v5  ;;  %v255_v11 = vsub.f32 1.0, %v254_v10  ;;  %516 = vmatpush.bf16.msra.mxu0 %v725_v48  ;;  %p972_p13 = pneg %p971_p6 }
  0x3f   : > { %731 = vmatpush.bf16.msra.mxu1 %v725_v48 }
  0x40   : > { %v256_v12 = vmul.f32 %v830_v9, %v255_v11  ;;  %735 = vmatpush.bf16.msra.mxu2 %v724_v49  ;;  %736 = vmatpush.bf16.msra.mxu3 %v724_v49  ;;  %v719_v11 = vld [vmem:[#allocation9] sm:$0xff]  ;;  %p977_p8 = pnand %p976_p5, %p972_p13 }
  0x42   : > { %v257_v13 = vadd.f32 %v830_v9, %v256_v12  ;;  %517 = vmatpush.bf16.msra.mxu0 %v724_v49 }
  0x43   : > { %734 = vmatpush.bf16.msra.mxu1 %v724_v49 }
  0x44   : > { %v259_v14 = vsel %vm258_vm0, %v830_v9, %v257_v13  ;;  %738 = vmatpush.bf16.msra.mxu2 %v723_v50  ;;  %739 = vmatpush.bf16.msra.mxu3 %v723_v50 }
  0x45   : > { %241 = vadd.xlane.f32.xlu0 %v1191_v6  ;;  %243 = vadd.xlane.f32.xlu1 %v1193_v7 }
  0x46   : > { %518 = vmatpush.bf16.msra.mxu0 %v723_v50 }
  0x47   : > { %737 = vmatpush.bf16.msra.mxu1 %v723_v50 }
  0x48   : > { %741 = vmatpush.bf16.msra.mxu2 %v722_v53  ;;  %742 = vmatpush.bf16.msra.mxu3 %v722_v53 }
  0x4a   : > { %519 = vmatpush.bf16.msra.mxu0 %v722_v53 }
  0x4b   : > { %740 = vmatpush.bf16.msra.mxu1 %v722_v53 }
  0x4c   : > { %744 = vmatpush.bf16.msra.mxu2 %v721_v56  ;;  %745 = vmatpush.bf16.msra.mxu3 %v721_v56 }
  0x4e   : > { %520 = vmatpush.bf16.msra.mxu0 %v721_v56 }
  0x4f   : > { %743 = vmatpush.bf16.msra.mxu1 %v721_v56 }
  0x50   : > { %747 = vmatpush.bf16.msra.mxu2 %v720_v57  ;;  %748 = vmatpush.bf16.msra.mxu3 %v720_v57 }
  0x52   : > { %521 = vmatpush.bf16.msra.mxu0 %v720_v57 }
  0x53   : > { %746 = vmatpush.bf16.msra.mxu1 %v720_v57 }
  0x54   : > { %750 = vmatpush.bf16.msra.mxu2 %v719_v11  ;;  %751 = vmatpush.bf16.msra.mxu3 %v719_v11 }
  0x56   : > { %522 = vmatpush.bf16.msra.mxu0 %v719_v11 }
  0x57   : > { %749 = vmatpush.bf16.msra.mxu1 %v719_v11 }
  0xa8   : > { %v250_v15 = vpop.xlane.xlu1 %249  ;;  %v246_v16 = vpop.xlane.xlu0 %245 }
  0xa9   : > { %v266_v17 = vmul.f32 %v259_v14, %v250_v15  ;;  %v264_v18 = vmul.f32 %v259_v14, %v246_v16  ;;  %v238_v19 = vpop.xlane.xlu2 %237 }
  0xaa   : > { %v260_v30 = vmul.f32 %v259_v14, %v238_v19 }
  0xab   : > { %v1198_v20 = vsub.f32 %v1173_v0, %v266_v17  ;;  %v1201_v21 = vsub.f32 %v1175_v1, %v264_v18 }
  0xac   : > { %v1223_v37 = vsub.f32 %v1177_v2, %v260_v30 }
  0xad   : > { %v282_v22 = vmul.f32 %v1198_v20, %v1198_v20  ;;  %v280_v23 = vmul.f32 %v1201_v21, %v1201_v21 }
  0xae   : > { %v276_v42 = vmul.f32 %v1223_v37, %v1223_v37 }
  0xaf   : > { %296 = vadd.xlane.f32.xlu1 %v282_v22  ;;  %292 = vadd.xlane.f32.xlu2 %v280_v23 }
  0xb0   : > { %v252_v24 = vpop.xlane.xlu1 %251  ;;  %v248_v25 = vpop.xlane.xlu0 %247 }
  0xb1   : > { %v267_v26 = vmul.f32 %v259_v14, %v252_v24  ;;  %v265_v27 = vmul.f32 %v259_v14, %v248_v25  ;;  %v240_v28 = vpop.xlane.xlu2 %239 }
  0xb2   : > { %v261_v29 = vmul.f32 %v259_v14, %v240_v28 }
  0xb3   : > { %v1208_v31 = vsub.f32 %v1182_v3, %v267_v26  ;;  %v1211_v32 = vsub.f32 %v1184_v4, %v265_v27 }
  0xb4   : > { %v1214_v33 = vsub.f32 %v1186_v5, %v261_v29 }
  0xb5   : > { %v281_v34 = vmul.f32 %v1211_v32, %v1211_v32  ;;  %v283_v35 = vmul.f32 %v1208_v31, %v1208_v31 }
  0xb6   : > { %v277_v36 = vmul.f32 %v1214_v33, %v1214_v33 }
  0xb7   : > { %294 = vadd.xlane.f32.xlu0 %v281_v34  ;;  %298 = vadd.xlane.f32.xlu2 %v283_v35 }
  0xb8   : > { %286 = vadd.xlane.f32.xlu1 %v277_v36  ;;  %v242_v38 = vpop.xlane.xlu0 %241  ;;  %v244_v39 = vpop.xlane.xlu1 %243 }
  0xb9   : > { %v262_v40 = vmul.f32 %v259_v14, %v242_v38  ;;  %v263_v43 = vmul.f32 %v259_v14, %v244_v39 }
  0xbb   : > { %v1226_v41 = vsub.f32 %v1191_v6, %v262_v40  ;;  %v1233_v45 = vsub.f32 %v1193_v7, %v263_v43 }
  0xbd   : > { %v278_v44 = vmul.f32 %v1226_v41, %v1226_v41  ;;  %v279_v46 = vmul.f32 %v1233_v45, %v1233_v45 }
  0xbf   : > { %288 = vadd.xlane.f32.xlu2 %v278_v44  ;;  %284 = vadd.xlane.f32.xlu0 %v276_v42 }
  0xc7   : > { %290 = vadd.xlane.f32.xlu0 %v279_v46 }
 0x122   : > { %v297_v51 = vpop.xlane.xlu1 %296  ;;  %v293_v52 = vpop.xlane.xlu2 %292 }
 0x123   : > { %v1237_v54 = vmul.f32 0.007874016, %v297_v51  ;;  %v1239_v55 = vmul.f32 0.007874016, %v293_v52 }
 0x125   : > { %831 = vrsqrt.f32 %v1237_v54  ;;  %vm363_vm1 = vcmp.eq.f32.partialorder %v1239_v55, inf  ;;  %vm365_vm2 = vcmp.eq.f32.partialorder %v1239_v55, 0.0  ;;  %v366_v28 = vand.u32 2147483648, %v1239_v55 }
 0x126   : > { %833 = vrsqrt.f32 %v1239_v55  ;;  %vm387_vm3 = vcmp.eq.f32.partialorder %v1237_v54, inf  ;;  %vm389_vm4 = vcmp.eq.f32.partialorder %v1237_v54, 0.0  ;;  %v390_v42 = vand.u32 2147483648, %v1237_v54 }
 0x12a   : > { %v295_v58 = vpop.xlane.xlu0 %294  ;;  %v299_v59 = vpop.xlane.xlu2 %298 }
 0x12b   : > { %v832_v60 = vpop.eup %831  ;;  %v1243_v61 = vmul.f32 0.007874016, %v295_v58  ;;  %v287_v62 = vpop.xlane.xlu1 %286  ;;  %v1245_v63 = vmul.f32 0.007874016, %v299_v59 }
 0x12c   : > { %v834_v8 = vpop.eup %833  ;;  %v381_v9 = vmul.f32 %v832_v60, %v1237_v54  ;;  %v1248_v10 = vmul.f32 0.007874016, %v287_v62 }
 0x12d   : > { %v357_v12 = vmul.f32 %v834_v8, %v1239_v55  ;;  %835 = vrsqrt.f32 %v1243_v61  ;;  %vm375_vm5 = vcmp.eq.f32.partialorder %v1243_v61, inf  ;;  %vm377_vm6 = vcmp.eq.f32.partialorder %v1243_v61, 0.0 }
 0x12e   : > { %837 = vrsqrt.f32 %v1248_v10  ;;  %v382_v13 = vmul.f32 %v832_v60, %v381_v9  ;;  %v378_v49 = vand.u32 2147483648, %v1243_v61  ;;  %vm399_vm7 = vcmp.eq.f32.partialorder %v1245_v63, inf }
 0x12f   : > { %839 = vrsqrt.f32 %v1245_v63  ;;  %v358_v14 = vmul.f32 %v834_v8, %v357_v12  ;;  %vm401_vm8 = vcmp.eq.f32.partialorder %v1245_v63, 0.0  ;;  %vm327_vm9 = vcmp.eq.f32.partialorder %v1248_v10, inf }
 0x130   : > { %v383_v15 = vmul.f32 0.5, %v382_v13  ;;  %vm329_vm10 = vcmp.eq.f32.partialorder %v1248_v10, 0.0 }
 0x131   : > { %v359_v16 = vmul.f32 0.5, %v358_v14 }
 0x132   : > { %v285_v17 = vpop.xlane.xlu0 %284  ;;  %v289_v18 = vpop.xlane.xlu2 %288  ;;  %v384_v19 = vsub.f32 1.5, %v383_v15 }
 0x133   : > { %v836_v22 = vpop.eup %835  ;;  %v1255_v23 = vmul.f32 0.007874016, %v285_v17  ;;  %v1257_v24 = vmul.f32 0.007874016, %v289_v18  ;;  %v360_v25 = vsub.f32 1.5, %v359_v16 }
 0x134   : > { %v838_v26 = vpop.eup %837  ;;  %v369_v27 = vmul.f32 %v836_v22, %v1243_v61  ;;  %v385_v29 = vmul.f32 %v832_v60, %v384_v19  ;;  %v402_v60 = vand.u32 2147483648, %v1245_v63  ;;  %v330_v19 = vand.u32 2147483648, %v1248_v10 }
 0x135   : > { %v840_v30 = vpop.eup %839  ;;  %v321_v34 = vmul.f32 %v838_v26, %v1248_v10  ;;  %841 = vrsqrt.f32 %v1255_v23  ;;  %v361_v35 = vmul.f32 %v834_v8, %v360_v25  ;;  %vm315_vm11 = vcmp.eq.f32.partialorder %v1255_v23, inf }
 0x136   : > { %v393_v36 = vmul.f32 %v840_v30, %v1245_v63  ;;  %843 = vrsqrt.f32 %v1257_v24  ;;  %v370_v38 = vmul.f32 %v836_v22, %v369_v27  ;;  %v386_v39 = vmul.f32 %v385_v29, %v1237_v54 }
 0x137   : > { %v362_v40 = vmul.f32 %v361_v35, %v1239_v55  ;;  %v322_v43 = vmul.f32 %v838_v26, %v321_v34  ;;  %vm317_vm12 = vcmp.eq.f32.partialorder %v1255_v23, 0.0  ;;  %vm339_vm13 = vcmp.eq.f32.partialorder %v1257_v24, inf }
 0x138   : > { %v371_v44 = vmul.f32 0.5, %v370_v38  ;;  %v388_v46 = vsel %vm387_vm3, %v1237_v54, %v386_v39  ;;  %v394_v47 = vmul.f32 %v840_v30, %v393_v36  ;;  %vm341_vm14 = vcmp.eq.f32.partialorder %v1257_v24, 0.0 }
 0x139   : > { %v364_v48 = vsel %vm363_vm1, %v1239_v55, %v362_v40  ;;  %v323_v50 = vmul.f32 0.5, %v322_v43  ;;  %v391_v56 = vsel %vm389_vm4, %v390_v42, %v388_v46 }
 0x13a   : > { %v291_v51 = vpop.xlane.xlu0 %290  ;;  %v367_v52 = vsel %vm365_vm2, %v366_v28, %v364_v48  ;;  %v372_v53 = vsub.f32 1.5, %v371_v44  ;;  %v395_v57 = vmul.f32 0.5, %v394_v47  ;;  %v410_v54 = vadd.f32 1e-06, %v391_v56  ;;  %v1301_v28 = vld [vmem:[#allocation7] ss:$0 sm:$0xff] }
 0x13b   : > { %v842_v58 = vpop.eup %841  ;;  %v1285_v59 = vmul.f32 0.007874016, %v291_v51  ;;  %v324_v62 = vsub.f32 1.5, %v323_v50  ;;  %v408_v12 = vadd.f32 1e-06, %v367_v52  ;;  %v425_v48 = vmul.f32 %v1301_v28, %v1201_v21 }
 0x13c   : > { %v844_v8 = vpop.eup %843  ;;  %v309_v9 = vmul.f32 %v842_v58, %v1255_v23  ;;  %v373_v11 = vmul.f32 %v836_v22, %v372_v53  ;;  %v396_v55 = vsub.f32 1.5, %v395_v57  ;;  %v318_v56 = vand.u32 2147483648, %v1255_v23 }
 0x13d   : > { %v333_v13 = vmul.f32 %v844_v8, %v1257_v24  ;;  %845 = vrsqrt.f32 %v1285_v59  ;;  %v325_v14 = vmul.f32 %v838_v26, %v324_v62  ;;  %vm351_vm15 = vcmp.eq.f32.partialorder %v1285_v59, inf }
 0x13e   : > { %v374_v15 = vmul.f32 %v373_v11, %v1243_v61  ;;  %v397_v16 = vmul.f32 %v840_v30, %v396_v55  ;;  %v310_v17 = vmul.f32 %v842_v58, %v309_v9  ;;  %847 = vrcp.f32 %v408_v12 }
 0x13f   : > { %v326_v18 = vmul.f32 %v325_v14, %v1248_v10  ;;  %v334_v22 = vmul.f32 %v844_v8, %v333_v13  ;;  %849 = vrcp.f32 %v410_v54  ;;  %v428_v13 = vmul.f32 %v1301_v28, %v1208_v31 }
 0x140   : > { %v376_v25 = vsel %vm375_vm5, %v1243_v61, %v374_v15  ;;  %v398_v26 = vmul.f32 %v397_v16, %v1245_v63  ;;  %v311_v27 = vmul.f32 0.5, %v310_v17  ;;  %vm353_vm0 = vcmp.eq.f32.partialorder %v1285_v59, 0.0 }
 0x141   : > { %v379_v29 = vsel %vm377_vm6, %v378_v49, %v376_v25  ;;  %v328_v30 = vsel %vm327_vm9, %v1248_v10, %v326_v18  ;;  %v335_v34 = vmul.f32 0.5, %v334_v22  ;;  %v427_v10 = vmul.f32 %v1301_v28, %v1198_v20 }
 0x142   : > { %v409_v35 = vadd.f32 1e-06, %v379_v29  ;;  %v400_v36 = vsel %vm399_vm7, %v1245_v63, %v398_v26  ;;  %v312_v38 = vsub.f32 1.5, %v311_v27  ;;  %v331_v39 = vsel %vm329_vm10, %v330_v19, %v328_v30 }
 0x143   : > { %v846_v40 = vpop.eup %845  ;;  %v403_v42 = vsel %vm401_vm8, %v402_v60, %v400_v36  ;;  %v405_v43 = vadd.f32 1e-06, %v331_v39  ;;  %v336_v44 = vsub.f32 1.5, %v335_v34  ;;  %v426_v49 = vmul.f32 %v1301_v28, %v1211_v32  ;;  %v827_v60 = vld [vmem:[#allocation7 + $0x1] ss:$0 sm:$0xff] }
 0x144   : > { %v345_v61 = vmul.f32 %v846_v40, %v1285_v59  ;;  %851 = vrcp.f32 %v409_v35  ;;  %v411_v46 = vadd.f32 1e-06, %v403_v42  ;;  %v313_v47 = vmul.f32 %v842_v58, %v312_v38  ;;  %v848_v51 = vpop.eup %847 }
 0x145   : > { %v337_v50 = vmul.f32 %v844_v8, %v336_v44  ;;  %v850_v53 = vpop.eup %849  ;;  %v342_v32 = vand.u32 2147483648, %v1257_v24  ;;  %v433_v58 = vmul.f32 %v848_v51, %v425_v48  ;;  %v354_v29 = vand.u32 2147483648, %v1285_v59  ;;  %v828_v51 = vld [vmem:[#allocation7 + $0x2] ss:$0 sm:$0xff] }
 0x146   : > { %853 = vrcp.f32 %v411_v46  ;;  %v314_v63 = vmul.f32 %v313_v47, %v1255_v23  ;;  %v346_v52 = vmul.f32 %v846_v40, %v345_v61  ;;  %v421_v34 = vmul.f32 %v1301_v28, %v1223_v37 }
 0x147   : > { %v338_v20 = vmul.f32 %v337_v50, %v1257_v24  ;;  %855 = vrcp.f32 %v405_v43  ;;  %v442_v17 = vadd.f32 %v827_v60, %v433_v58  ;;  %v423_v61 = vmul.f32 %v1301_v28, %v1226_v41 }
 0x148   : > { %v316_v21 = vsel %vm315_vm11, %v1255_v23, %v314_v63  ;;  %v347_v57 = vmul.f32 0.5, %v346_v52  ;;  %v435_v23 = vmul.f32 %v850_v53, %v427_v10  ;;  %v424_v46 = vmul.f32 %v1301_v28, %v1233_v45 }
 0x149   : > { %v319_v62 = vsel %vm317_vm12, %v318_v56, %v316_v21  ;;  %v340_v8 = vsel %vm339_vm13, %v1257_v24, %v338_v20  ;;  %v422_v24 = vmul.f32 %v1301_v28, %v1214_v33 }
 0x14a   : > { %v852_v9 = vpop.eup %851  ;;  %v404_v11 = vadd.f32 1e-06, %v319_v62  ;;  %v343_v12 = vsel %vm341_vm14, %v342_v32, %v340_v8  ;;  %v348_v55 = vsub.f32 1.5, %v347_v57  ;;  %v444_v27 = vadd.f32 %v827_v60, %v435_v23 }
 0x14b   : > { %v434_v54 = vmul.f32 %v852_v9, %v426_v49  ;;  %v406_v16 = vadd.f32 1e-06, %v343_v12 }
 0x14c   : > { %v854_v14 = vpop.eup %853  ;;  %857 = vrcp.f32 %v404_v11  ;;  %v349_v15 = vmul.f32 %v846_v40, %v348_v55 }
 0x14d   : > { %v443_v18 = vadd.f32 %v827_v60, %v434_v54  ;;  %v436_v19 = vmul.f32 %v854_v14, %v428_v13  ;;  %v856_v22 = vpop.eup %855  ;;  %859 = vrcp.f32 %v406_v16 }
 0x14e   : > { %v350_v25 = vmul.f32 %v349_v15, %v1285_v59  ;;  %v430_v33 = vmul.f32 %v856_v22, %v422_v24 }
 0x14f   : > { %v448_v26 = vpack.c.bf16 %v443_v18, %v442_v17  ;;  %v445_v31 = vadd.f32 %v827_v60, %v436_v19 }
 0x150   : > { %v352_v30 = vsel %vm351_vm15, %v1285_v59, %v350_v25  ;;  %v439_v43 = vadd.f32 %v827_v60, %v430_v33 }
 0x151   : > { %533 = vmatmul.bf16.vlgmr.msra.gmra.mxu2 %v448_v26  ;;  %v449_v35 = vpack.c.bf16 %v445_v31, %v444_v27  ;;  %v355_v36 = vsel %vm353_vm0, %v354_v29, %v352_v30 }
 0x152   : > { %v858_v38 = vpop.eup %857  ;;  %v407_v39 = vadd.f32 1e-06, %v355_v36 }
 0x153   : > { %538 = vmatmul.bf16.vlgmr.msra.gmra.mxu3 %v449_v35  ;;  %v429_v40 = vmul.f32 %v858_v38, %v421_v34  ;;  %v860_v44 = vpop.eup %859 }
 0x154   : > { %861 = vrcp.f32 %v407_v39  ;;  %v431_v37 = vmul.f32 %v860_v44, %v423_v61 }
 0x155   : > { %v438_v42 = vadd.f32 %v827_v60, %v429_v40 }
 0x156   : > { %v440_v48 = vadd.f32 %v827_v60, %v431_v37 }
 0x157   : > { %v446_v59 = vpack.c.bf16 %v439_v43, %v438_v42 }
 0x159   : > { %523 = vmatmul.bf16.vlgmr.msra.gmra.mxu0 %v446_v59 }
 0x15a   : > { %v862_v47 = vpop.eup %861 }
 0x15b   : > { %v432_v10 = vmul.f32 %v862_v47, %v424_v46 }
 0x15d   : > { %v441_v49 = vadd.f32 %v827_v60, %v432_v10 }
 0x15f   : > { %v447_v50 = vpack.c.bf16 %v441_v49, %v440_v48 }
 0x161   : > { %528 = vmatmul.bf16.vlgmr.msra.gmra.mxu1 %v447_v50 }
 0x1d4   : > { %v534_v63 = vpop.f32.mrf.mxu2 }
 0x1d5   : > { %v535_v52 = vadd.f32 %v828_v51, %v534_v63 }
 0x1d6   : > { %v539_v53 = vpop.f32.mrf.mxu3  ;;  %v524_v56 = vpop.f32.mrf.mxu0 }
 0x1d7   : > { %v548_v41 = vadd.f32 %v535_v52, %v1175_v1  ;;  %v540_v20 = vadd.f32 %v828_v51, %v539_v53  ;;  %v525_v21 = vadd.f32 %v828_v51, %v524_v56 }
 0x1d9   : > { %556 = vst [vmem:[%s1346_s25 + $0x20] sm:$0xff] %v548_v41  ;;  %v550_v45 = vadd.f32 %v540_v20, %v1173_v0  ;;  %v544_v28 = vadd.f32 %v525_v21, %v1177_v2 }
 0x1db   : > { %558 = vst [vmem:[%s1346_s25 + $0x30] sm:$0xff] %v550_v45 }
 0x1dc   : > { %552 = vst [vmem:[%s1346_s25] sm:$0xff] %v544_v28  ;;  %v536_v32 = vpop.f32.mrf.mxu2 }
 0x1dd   : > { %v537_v1 = vadd.f32 %v828_v51, %v536_v32 }
 0x1de   : > { %v541_v57 = vpop.f32.mrf.mxu3  ;;  %v526_v58 = vpop.f32.mrf.mxu0 }
 0x1df   : > { %v549_v60 = vadd.f32 %v537_v1, %v1184_v4  ;;  %v542_v62 = vadd.f32 %v828_v51, %v541_v57  ;;  %v527_v8 = vadd.f32 %v828_v51, %v526_v58  ;;  %v529_v9 = vpop.f32.mrf.mxu1 }
 0x1e0   : > { %v530_v11 = vadd.f32 %v828_v51, %v529_v9 }
 0x1e1   : > { %557 = vst [vmem:[%s1346_s25 + $0x28] sm:$0xff] %v549_v60  ;;  %v551_v0 = vadd.f32 %v542_v62, %v1182_v3  ;;  %v545_v2 = vadd.f32 %v527_v8, %v1186_v5 }
 0x1e2   : > { %v546_v12 = vadd.f32 %v530_v11, %v1191_v6 }
 0x1e3   : > { %559 = vst [vmem:[%s1346_s25 + $0x38] sm:$0xff] %v551_v0 }
 0x1e4   : > { %553 = vst [vmem:[%s1346_s25 + $0x8] sm:$0xff] %v545_v2 }
 0x1e5   : > { %554 = vst [vmem:[%s1346_s25 + $0x10] sm:$0xff] %v546_v12 }
 0x1e7   : > { %v531_v4 = vpop.f32.mrf.mxu1 }
 0x1e8   : > { %v532_v55 = vadd.f32 %v828_v51, %v531_v4 }
 0x1ea   : > { %v547_v3 = vadd.f32 %v532_v55, %v1193_v7 }
 0x1ec   : > { %555 = vst [vmem:[%s1346_s25 + $0x18] sm:$0xff] %v547_v3 }
 0x1ed   : > { %980 = shalt.err (!%p977_p8)
}
 0x1ee   : > { %s1032_s22 = smov 128   ;;  %s1033_s30 = smov 8  }
 0x1ef   : > { %762 = dma.vmem_to_hbm [thread:$0]  (%p1111_p11), %s574_s7, 1024, %s576_s9, %s561_s18, %s1032_s22, %s1032_s22, %s1033_s30  }
 0x1f0 PF: > { %s590_s2 = sand.u32 1, %s1011_s15   ;;  %p1410_p9 = scmp.ge.s32.totalorder %s1023_s17, 2 }
 0x1f1   : > { %s591_s6 = scalar_lea.sflag [#allocation6], %s590_s2 }
 0x1f2   : > { %p776_p10 = pnand %p1410_p9, %p1115_p12 }
 0x1f4   : > { %p777_p1 = pneg %p776_p10 }
 0x1f6   : > { %1006 = dma.done.wait (%p777_p1), %s591_s6, 1024  }
 0x1f7   : > { %1008 = vsyncadd (%p777_p1), %s591_s6, 4294966272  ;;  %p19_p2 = scmp.ge.s32.totalorder %s1084_s20, 4   ;;  %s1411_s15 = smov %s1015_s0 }
 0x1f8   : > { %s1412_s0 = smov %s1019_s16  ;;  %s1413_s16 = smov %s1096_s23 }
 0x1f9   : > { %s1414_s17 = smov %s1084_s20  ;;  %21 = sbr.rel (!%p19_p2) target bundleno = 8 (0x8), region = 85 }
 0x1fe   :  { %597 = vsyncpa [#allocation5], 1 }
 0x1ff   :  { %599 = vsyncpa [#allocation5 + $0x1], 1 }
 0x200   :  { %600 = vsyncpa [#allocation8], 1 }
 0x201   :  { %601 = vsyncpa [#allocation6], 1 }
 0x202   :  { %603 = vsyncpa [#allocation6 + $0x1], 1 }

</bundles_post_ra>
